<compile_context>
chip_gen: v7x
topology: tpu7x:2x2x1
jax: 0.10.0
libtpu: 0.0.40
codegen_flags: <defaults>
</compile_context>

<pallas_src>
import math

import jax
import jax.numpy as jnp
from jax.experimental import pallas as pl
from jax.experimental.pallas import tpu as pltpu

SUBLANE = 8            # f32 sublane multiple for batch tiles
DEF_TB = 128           # batch tile (tunable; bigger tiles amortize per-step overhead)
PALLAS_MIN_BATCH = 64  # below this, fixed pallas_call overhead dominates -> plain XLA


def _round_up(n, m):
    return ((n + m - 1) // m) * m


def _mlp_kernel(x_ref, w1_ref, b1_ref, w2_ref, b2_ref, w3_ref, b3_ref, o_ref):
    # x arrives f32 from HBM; cast to bf16 on the VPU (free under mem-bound),
    # weights are already bf16 and VMEM-resident.  f32 accumulation on the MXU.
    x = x_ref[...].astype(jnp.bfloat16)

    # Layer 1: Linear + bias + ReLU (bias/ReLU in f32 on the VPU)
    h1 = jnp.dot(x, w1_ref[...], preferred_element_type=jnp.float32)
    h1 = jnp.maximum(h1 + b1_ref[...], 0.0)

    # Layer 2
    h2 = jnp.dot(h1.astype(jnp.bfloat16), w2_ref[...],
                 preferred_element_type=jnp.float32)
    h2 = jnp.maximum(h2 + b2_ref[...], 0.0)

    # Layer 3 (head, no activation)
    out = jnp.dot(h2.astype(jnp.bfloat16), w3_ref[...],
                  preferred_element_type=jnp.float32)
    o_ref[...] = (out + b3_ref[...]).astype(o_ref.dtype)


def network_forward(x, params, *, tb=DEF_TB):
    """Fused 3-layer MLP forward.

    Batch axis is tiled across a 1-D grid ("parallel" -> megacore sharding on
    v7x); weights/biases are single VMEM-resident blocks reused every step.
    Feature dims are NOT padded (blocks use the full last dim); only the batch
    axis is padded to a tile multiple when necessary and stripped on return.
    """
    w1, b1, w2, b2, w3, b3 = params
    batch, in_dim = x.shape
    hid = w1.shape[1]
    out_dim = w3.shape[1]

    # Tiny batches: per-call overhead dominates a few-kFLOP MLP; plain XLA wins.
    if batch < PALLAS_MIN_BATCH:
        return reference_forward(x, params)

    # One-off casts of the (tiny) resident operands; x stays f32 in HBM.
    w1b = w1.astype(jnp.bfloat16)
    w2b = w2.astype(jnp.bfloat16)
    w3b = w3.astype(jnp.bfloat16)
    b1f = b1.astype(jnp.float32)
    b2f = b2.astype(jnp.float32)
    b3f = b3.astype(jnp.float32)

    tb = min(tb, _round_up(batch, SUBLANE))
    batch_p = _round_up(batch, tb)
    xp = x if batch_p == batch else jnp.pad(x, ((0, batch_p - batch), (0, 0)))

    grid = (batch_p // tb,)
    # Constant block index -> weights/biases DMA'd once, stay resident in VMEM.
    resident = lambda arr: pl.BlockSpec(arr.shape, lambda i: (0, 0))

    flops = 2 * batch_p * (in_dim * hid + hid * hid + hid * out_dim)
    bytes_accessed = (
        batch_p * in_dim * 4                              # f32 activations in
        + (w1b.size + w2b.size + w3b.size) * 2            # bf16 weights
        + (b1f.size + b2f.size + b3f.size) * 4            # f32 biases
        + batch_p * out_dim * 4                           # f32 output
    )

    out = pl.pallas_call(
        _mlp_kernel,
        out_shape=jax.ShapeDtypeStruct((batch_p, out_dim), jnp.float32),
        grid=grid,
        in_specs=[
            pl.BlockSpec((tb, in_dim), lambda i: (i, 0)),  # x: tiled along batch
            resident(w1b), resident(b1f),
            resident(w2b), resident(b2f),
            resident(w3b), resident(b3f),
        ],
        out_specs=pl.BlockSpec((tb, out_dim), lambda i: (i, 0)),
        compiler_params=pltpu.CompilerParams(
            dimension_semantics=("parallel",),             # megacore split on v7x
            vmem_limit_bytes=32 * 1024 * 1024,
        ),
        cost_estimate=pl.CostEstimate(
            flops=flops, transcendentals=0, bytes_accessed=bytes_accessed),
    )(xp, w1b, b1f, w2b, b2f, w3b, b3f)

    return out[:batch] if batch_p != batch else out


def xavier_uniform(key, fan_in, fan_out, dtype=jnp.float32):
    """torch.nn.init.xavier_uniform_ equivalent (gain=1)."""
    bound = math.sqrt(6.0 / (fan_in + fan_out))
    # Stored [in, out] (transposed vs PyTorch [out, in]); symmetric law -> identical init.
    return jax.random.uniform(
        key, (fan_in, fan_out), dtype=dtype, minval=-bound, maxval=bound
    )


def init_params(key, in_dim, hidden_dim, out_dim):
    k1, k2, k3 = jax.random.split(key, 3)
    w1 = xavier_uniform(k1, in_dim, hidden_dim)
    b1 = jnp.zeros((1, hidden_dim), jnp.float32)
    w2 = xavier_uniform(k2, hidden_dim, hidden_dim)
    b2 = jnp.zeros((1, hidden_dim), jnp.float32)
    w3 = xavier_uniform(k3, hidden_dim, out_dim)
    b3 = jnp.zeros((1, out_dim), jnp.float32)
    return (w1, b1, w2, b2, w3, b3)


def reference_forward(x, params):
    """Pure-JAX f32 reference for correctness checking."""
    w1, b1, w2, b2, w3, b3 = params
    h1 = jnp.maximum(x @ w1 + b1, 0.0)
    h2 = jnp.maximum(h1 @ w2 + b2, 0.0)
    return h2 @ w3 + b3


if __name__ == "__main__":
    key = jax.random.PRNGKey(0)
    k_x, k_p = jax.random.split(key)

    # Small RL-style shapes; batch large enough that the tiled Pallas path
    # engages (grid of 2 batch tiles of 128).
    batch, in_dim, hidden_dim, out_dim = 256, 32, 32, 8
    x = jax.random.normal(k_x, (batch, in_dim), dtype=jnp.float32)
    params = init_params(k_p, in_dim, hidden_dim, out_dim)

    out = network_forward(x, params)
    out = jax.block_until_ready(out)

    ref = reference_forward(x, params)
    assert out.shape == (batch, out_dim)
    # bf16 matmul operands (f32 accumulation) -> loosened tolerance vs f32 ref.
    assert jnp.allclose(out, ref, atol=5e-2, rtol=5e-2), "mismatch vs reference"

    print("KERNEL_OK")
</pallas_src>

<mosaic_0001>
module attributes {stable_mosaic.version = 11 : i64} {
  func.func @_mlp_kernel(%arg0: i32, %arg1: memref<128x32xf32, #tpu.memory_space<vmem>>, %arg2: memref<32x32xbf16, #tpu.memory_space<vmem>>, %arg3: memref<1x32xf32, #tpu.memory_space<vmem>>, %arg4: memref<32x32xbf16, #tpu.memory_space<vmem>>, %arg5: memref<1x32xf32, #tpu.memory_space<vmem>>, %arg6: memref<32x8xbf16, #tpu.memory_space<vmem>>, %arg7: memref<1x8xf32, #tpu.memory_space<vmem>>, %arg8: memref<128x8xf32, #tpu.memory_space<vmem>>) attributes {dimension_semantics = [#tpu.dimension_semantics<parallel>], iteration_bounds = array<i64: 2>, scalar_prefetch = 0 : i64, scratch_operands = 0 : i64, tpu.core_type = #tpu.core_type<tc>, window_params = [{transform_indices = @transform_0, window_bounds = array<i64: 128, 32>}, {pipeline_mode = #tpu.pipeline_mode<synchronous>, transform_indices = @transform_1, window_bounds = array<i64: 32, 32>}, {pipeline_mode = #tpu.pipeline_mode<synchronous>, transform_indices = @transform_2, window_bounds = array<i64: 1, 32>}, {pipeline_mode = #tpu.pipeline_mode<synchronous>, transform_indices = @transform_3, window_bounds = array<i64: 32, 32>}, {pipeline_mode = #tpu.pipeline_mode<synchronous>, transform_indices = @transform_4, window_bounds = array<i64: 1, 32>}, {pipeline_mode = #tpu.pipeline_mode<synchronous>, transform_indices = @transform_5, window_bounds = array<i64: 32, 8>}, {pipeline_mode = #tpu.pipeline_mode<synchronous>, transform_indices = @transform_6, window_bounds = array<i64: 1, 8>}, {transform_indices = @transform_7, window_bounds = array<i64: 128, 8>}]} {
    %c0 = arith.constant 0 : index
    %c0_0 = arith.constant 0 : index
    %0 = vector.load %arg1[%c0, %c0_0] : memref<128x32xf32, #tpu.memory_space<vmem>>, vector<128x32xf32>
    %1 = arith.truncf %0 : vector<128x32xf32> to vector<128x32xbf16>
    %c0_1 = arith.constant 0 : index
    %c0_2 = arith.constant 0 : index
    %2 = vector.load %arg2[%c0_1, %c0_2] : memref<32x32xbf16, #tpu.memory_space<vmem>>, vector<32x32xbf16>
    %cst = arith.constant dense<0.000000e+00> : vector<128x32xf32>
    %3 = tpu.matmul %1, %2, %cst {dimension_numbers = #tpu.dot_dimension_numbers<[1], [0], [0], [1], [0, 0, 1, 1], [], []>} : vector<128x32xbf16>, vector<32x32xbf16>, vector<128x32xf32> -> vector<128x32xf32>
    %c0_3 = arith.constant 0 : index
    %c0_4 = arith.constant 0 : index
    %4 = vector.load %arg3[%c0_3, %c0_4] : memref<1x32xf32, #tpu.memory_space<vmem>>, vector<1x32xf32>
    %5 = vector.broadcast %4 : vector<1x32xf32> to vector<128x32xf32>
    %6 = arith.addf %3, %5 : vector<128x32xf32>
    %cst_5 = arith.constant 0.000000e+00 : f32
    %7 = vector.broadcast %cst_5 : f32 to vector<128x32xf32>
    %8 = arith.maximumf %6, %7 : vector<128x32xf32>
    %9 = arith.truncf %8 : vector<128x32xf32> to vector<128x32xbf16>
    %c0_6 = arith.constant 0 : index
    %c0_7 = arith.constant 0 : index
    %10 = vector.load %arg4[%c0_6, %c0_7] : memref<32x32xbf16, #tpu.memory_space<vmem>>, vector<32x32xbf16>
    %cst_8 = arith.constant dense<0.000000e+00> : vector<128x32xf32>
    %11 = tpu.matmul %9, %10, %cst_8 {dimension_numbers = #tpu.dot_dimension_numbers<[1], [0], [0], [1], [0, 0, 1, 1], [], []>} : vector<128x32xbf16>, vector<32x32xbf16>, vector<128x32xf32> -> vector<128x32xf32>
    %c0_9 = arith.constant 0 : index
    %c0_10 = arith.constant 0 : index
    %12 = vector.load %arg5[%c0_9, %c0_10] : memref<1x32xf32, #tpu.memory_space<vmem>>, vector<1x32xf32>
    %13 = vector.broadcast %12 : vector<1x32xf32> to vector<128x32xf32>
    %14 = arith.addf %11, %13 : vector<128x32xf32>
    %cst_11 = arith.constant 0.000000e+00 : f32
    %15 = vector.broadcast %cst_11 : f32 to vector<128x32xf32>
    %16 = arith.maximumf %14, %15 : vector<128x32xf32>
    %17 = arith.truncf %16 : vector<128x32xf32> to vector<128x32xbf16>
    %c0_12 = arith.constant 0 : index
    %c0_13 = arith.constant 0 : index
    %18 = vector.load %arg6[%c0_12, %c0_13] : memref<32x8xbf16, #tpu.memory_space<vmem>>, vector<32x8xbf16>
    %cst_14 = arith.constant dense<0.000000e+00> : vector<128x8xf32>
    %19 = tpu.matmul %17, %18, %cst_14 {dimension_numbers = #tpu.dot_dimension_numbers<[1], [0], [0], [1], [0, 0, 1, 1], [], []>} : vector<128x32xbf16>, vector<32x8xbf16>, vector<128x8xf32> -> vector<128x8xf32>
    %c0_15 = arith.constant 0 : index
    %c0_16 = arith.constant 0 : index
    %20 = vector.load %arg7[%c0_15, %c0_16] : memref<1x8xf32, #tpu.memory_space<vmem>>, vector<1x8xf32>
    %21 = vector.broadcast %20 : vector<1x8xf32> to vector<128x8xf32>
    %22 = arith.addf %19, %21 : vector<128x8xf32>
    %c0_17 = arith.constant 0 : index
    %c0_18 = arith.constant 0 : index
    %23 = vector.load %arg8[%c0_17, %c0_18] : memref<128x8xf32, #tpu.memory_space<vmem>>, vector<128x8xf32>
    tpu.vector_store %arg8[%c0_17, %c0_18], %22 {strides = array<i32>} : memref<128x8xf32, #tpu.memory_space<vmem>>, vector<128x8xf32>,
    return
  }
  func.func @transform_0(%arg0: i32) -> (i32, i32) {
    %c0_i32 = arith.constant 0 : i32
    %c0_i32_0 = arith.constant 0 : i32
    return %arg0, %c0_i32 : i32, i32
  }
  func.func @transform_1(%arg0: i32) -> (i32, i32) {
    %c0_i32 = arith.constant 0 : i32
    %c0_i32_0 = arith.constant 0 : i32
    %c0_i32_1 = arith.constant 0 : i32
    return %c0_i32, %c0_i32_0 : i32, i32
  }
  func.func @transform_2(%arg0: i32) -> (i32, i32) {
    %c0_i32 = arith.constant 0 : i32
    %c0_i32_0 = arith.constant 0 : i32
    %c0_i32_1 = arith.constant 0 : i32
    return %c0_i32, %c0_i32_0 : i32, i32
  }
  func.func @transform_3(%arg0: i32) -> (i32, i32) {
    %c0_i32 = arith.constant 0 : i32
    %c0_i32_0 = arith.constant 0 : i32
    %c0_i32_1 = arith.constant 0 : i32
    return %c0_i32, %c0_i32_0 : i32, i32
  }
  func.func @transform_4(%arg0: i32) -> (i32, i32) {
    %c0_i32 = arith.constant 0 : i32
    %c0_i32_0 = arith.constant 0 : i32
    %c0_i32_1 = arith.constant 0 : i32
    return %c0_i32, %c0_i32_0 : i32, i32
  }
  func.func @transform_5(%arg0: i32) -> (i32, i32) {
    %c0_i32 = arith.constant 0 : i32
    %c0_i32_0 = arith.constant 0 : i32
    %c0_i32_1 = arith.constant 0 : i32
    return %c0_i32, %c0_i32_0 : i32, i32
  }
  func.func @transform_6(%arg0: i32) -> (i32, i32) {
    %c0_i32 = arith.constant 0 : i32
    %c0_i32_0 = arith.constant 0 : i32
    %c0_i32_1 = arith.constant 0 : i32
    return %c0_i32, %c0_i32_0 : i32, i32
  }
  func.func @transform_7(%arg0: i32) -> (i32, i32) {
    %c0_i32 = arith.constant 0 : i32
    %c0_i32_0 = arith.constant 0 : i32
    return %arg0, %c0_i32 : i32, i32
  }
}

</mosaic_0001>

<bundles_post_ra>
// kernel: tpu_custom_call.1
= control target key start
LH: loop header
LB: loop body
LE: loop exit
PB: predicated region body
PF: predicated region fallthrough
CT: control target
= control target key end

     0   :  { %s1061_s24 = smov 0   ;;  %s1188_s0 = inlined_call_operand.vmem [shape: f32[256,32], index: 0, kind: input, shape index: {}]   ;;  %s1189_s1 = inlined_call_operand.vmem [shape: bf16[32,32], index: 1, kind: input, shape index: {}]   ;;  %s1190_s2 = inlined_call_operand.vmem [shape: f32[1,32], index: 2, kind: input, shape index: {}]   ;;  %s1191_s3 = inlined_call_operand.vmem [shape: bf16[32,32], index: 3, kind: input, shape index: {}]   ;;  %s1192_s4 = inlined_call_operand.vmem [shape: f32[1,32], index: 4, kind: input, shape index: {}]   ;;  %s1193_s5 = inlined_call_operand.vmem [shape: bf16[32,8], index: 5, kind: input, shape index: {}]   ;;  %s1194_s6 = inlined_call_operand.vmem [shape: f32[1,8], index: 6, kind: input, shape index: {}]   ;;  %s1195_s7 = inlined_call_operand.vmem [shape: f32[256,8], index: 7, kind: output, shape index: {}]  }
   0x1 LB: > { %s861_s25 = sadd.s32 4294967295, %s1019_s24   ;;  %p865_p0 = scmp.ge.s32.totalorder %s1019_s24, 1  ;;  %s1019_s24 = sphi %s1061_s24, %s17_s24  }
   0x2   : > { %p238_p1 = scmp.lt.s32.totalorder %s1019_s24, 3 }
   0x4   : > { %p239_p2 = pnand %p865_p0, %p238_p1 }
   0x5   : > { %v1007_v0 = vld [vmem:[%s1189_s1] sm:$0xff] (!%p239_p2)   ;;  %s866_s28 = sshll.u32 (!%p239_p2), %s861_s25, 4  ;;  %v1008_v1 = vld [vmem:[%s1189_s1 + $0x8] sm:$0xff] (!%p239_p2)   ;;  %vm330_vm0 = vcmask (!%p239_p2), 261120   ;;  %vm788_vm1 = vcmask (!%p239_p2), 64512  }
   0x6   : > { %242 = sbr.rel (%p239_p2) target bundleno = 706 (0x2c2), region = 48  ;;  %p271_p3 = scmp.lt.s32.totalorder (!%p239_p2), %s866_s28, 31  ;;  %935 = vmatprep.subr.bf16.mxu0 (!%p239_p2), %v1007_v0  ;;  %995 = vmatprep.subr.bf16.mxu1 (!%p239_p2), %v1007_v0  ;;  %v1009_v2 = vld [vmem:[%s1191_s3] sm:$0xff] (!%p239_p2)   ;;  %v1010_v27 = vld [vmem:[%s1191_s3 + $0x8] sm:$0xff] (!%p239_p2)  }
   0x7   : > { %936 = vmatpush3.bf16.msra.mxu0 (!%p239_p2), %v1007_v0  ;;  %997 = vmatpush3.bf16.msra.mxu1 (!%p239_p2), %v1007_v0  ;;  %v1011_v28 = vld [vmem:[%s1193_s5] sm:$0xff] (!%p239_p2)  }
   0x8   : > { %937 = vmatprep.subr.bf16.mxu0 (!%p239_p2), %v1008_v1  ;;  %996 = vmatprep.subr.bf16.mxu1 (!%p239_p2), %v1008_v1  ;;  %v870_v29 = vld [vmem:[%s1190_s2] ss:$0 sm:$0xff] (!%p239_p2) }
   0xb   : > { %938 = vmatpush3.bf16.msra.mxu0 (!%p239_p2), %v1008_v1  ;;  %998 = vmatpush3.bf16.msra.mxu1 (!%p239_p2), %v1008_v1 }
   0xc   : > { %955 = vmatprep.subr.bf16.mxu1 (!%p239_p2), %v1009_v2  ;;  %975 = vmatprep.subr.bf16.mxu0 (!%p239_p2), %v1011_v28 }
   0xd   : > { %s1197_s28 = smov (!%p271_p3, %s866_s28), 31 }
   0xe   : > { %s867_s10 = sshll.u32 %s1197_s28, 3 }
   0xf   : > { %s1086_s13 = scalar_lea.vmem %s1188_s0, %s867_s10  ;;  %s1151_s30 = scalar_lea.vmem %s1195_s7, %s867_s10 }
  0x10   : > { %v283_v3 = vld [vmem:[%s1086_s13] sm:$0xff]  ;;  %v284_v4 = vld [vmem:[%s1086_s13 + $0x8] sm:$0xff]  ;;  %v285_v5 = vld [vmem:[%s1086_s13 + $0x10] sm:$0xff] }
  0x11   : > { %v299_v6 = vpack.c.bf16 %v284_v4, %v283_v3  ;;  %v286_v7 = vld [vmem:[%s1086_s13 + $0x18] sm:$0xff]  ;;  %v287_v8 = vld [vmem:[%s1086_s13 + $0x20] sm:$0xff]  ;;  %v288_v9 = vld [vmem:[%s1086_s13 + $0x28] sm:$0xff] }
  0x12   : > { %v300_v10 = vpack.c.bf16 %v286_v7, %v285_v5  ;;  %v301_v11 = vpack.c.bf16 %v288_v9, %v287_v8  ;;  %v291_v12 = vld [vmem:[%s1086_s13 + $0x40] sm:$0xff]  ;;  %v292_v13 = vld [vmem:[%s1086_s13 + $0x48] sm:$0xff]  ;;  %v293_v14 = vld [vmem:[%s1086_s13 + $0x50] sm:$0xff] }
  0x13   : > { %939 = vmatprep.mubr.msk.bf16.mxu0 %vm330_vm0, %v299_v6  ;;  %v294_v15 = vld [vmem:[%s1086_s13 + $0x58] sm:$0xff]  ;;  %v303_v16 = vpack.c.bf16 %v292_v13, %v291_v12  ;;  %v295_v18 = vld [vmem:[%s1086_s13 + $0x60] sm:$0xff]  ;;  %v296_v19 = vld [vmem:[%s1086_s13 + $0x68] sm:$0xff] }
  0x14   : > { %940 = vmatmul.mubr.msk.bf16.vlgmr.msra.gmra.mrb[0].mxu0 %vm330_vm0, %v300_v10  ;;  %v304_v17 = vpack.c.bf16 %v294_v15, %v293_v14  ;;  %v289_v20 = vld [vmem:[%s1086_s13 + $0x30] sm:$0xff]  ;;  %v290_v21 = vld [vmem:[%s1086_s13 + $0x38] sm:$0xff]  ;;  %v305_v22 = vpack.c.bf16 %v296_v19, %v295_v18 }
  0x15   : > { %943 = vmatprep.mubr.msk.bf16.mxu0 %vm330_vm0, %v301_v11  ;;  %947 = vmatprep.mubr.msk.bf16.mxu1 %vm330_vm0, %v303_v16  ;;  %v302_v23 = vpack.c.bf16 %v290_v21, %v289_v20  ;;  %v297_v24 = vld [vmem:[%s1086_s13 + $0x70] sm:$0xff]  ;;  %v298_v25 = vld [vmem:[%s1086_s13 + $0x78] sm:$0xff] }
  0x16   : > { %948 = vmatmul.mubr.msk.bf16.vlgmr.msra.gmra.mrb[0].mxu1 %vm330_vm0, %v304_v17  ;;  %v306_v26 = vpack.c.bf16 %v298_v25, %v297_v24  ;;  %976 = vmatpush3.bf16.msra.mxu0 %v1011_v28 }
  0x17   : > { %951 = vmatprep.mubr.msk.bf16.mxu1 %vm330_vm0, %v305_v22  ;;  %956 = vmatpush3.bf16.msra.mxu1 %v1009_v2  ;;  %v1012_v22 = vld [vmem:[%s1193_s5 + $0x8] sm:$0xff]  }
  0x18   : > { %957 = vmatprep.subr.bf16.mxu1 %v1010_v27  ;;  %977 = vmatprep.subr.bf16.mxu0 %v1012_v22 }
  0x1a   : > { %978 = vmatpush3.bf16.msra.mxu0 %v1012_v22 }
  0x1b   : > { %958 = vmatpush3.bf16.msra.mxu1 %v1010_v27 }
  0x1c   : > { %944 = vmatmul.mubr.msk.bf16.gmra.mrb[4].mxu0 %vm330_vm0, %v302_v23  ;;  %v881_v23 = vld [vmem:[%s1192_s4] ss:$0 sm:$0xff] }
  0x1e   : > { %952 = vmatmul.mubr.msk.bf16.gmra.mrb[4].mxu1 %vm330_vm0, %v306_v26 }
  0xe7   : > { %v941_v30 = vpop.f32.mrb[0].mxu0 }
  0xe8   : > { %v398_v31 = vadd.f32 %v941_v30, %v870_v29  ;;  %v389_v32 = vpop.f32.mrb[1].mxu0 }
  0xe9   : > { %v390_v33 = vadd.f32 %v870_v29, %v389_v32  ;;  %v942_v34 = vpop.f32.mrb[2].mxu0  ;;  %v949_v37 = vpop.f32.mrb[0].mxu1 }
  0xea   : > { %v401_v35 = vadd.f32 %v942_v34, %v870_v29  ;;  %v392_v36 = vpop.f32.mrb[3].mxu0  ;;  %v430_v39 = vadd.f32 %v949_v37, %v870_v29  ;;  %v421_v40 = vpop.f32.mrb[1].mxu1  ;;  %v454_v41 = vmax.f32 %v398_v31, 0.0 }
  0xeb   : > { %v393_v38 = vadd.f32 %v870_v29, %v392_v36  ;;  %v422_v43 = vadd.f32 %v870_v29, %v421_v40  ;;  %v950_v44 = vpop.f32.mrb[2].mxu1  ;;  %v452_v45 = vmax.f32 %v390_v33, 0.0 }
  0xec   : > { %v455_v42 = vmax.f32 %v401_v35, 0.0  ;;  %v462_v47 = vmax.f32 %v430_v39, 0.0  ;;  %v433_v48 = vadd.f32 %v950_v44, %v870_v29  ;;  %v424_v49 = vpop.f32.mrb[3].mxu1 }
  0xed   : > { %v453_v46 = vmax.f32 %v393_v38, 0.0  ;;  %v460_v51 = vmax.f32 %v422_v43, 0.0  ;;  %v425_v52 = vadd.f32 %v870_v29, %v424_v49 }
  0xee   : > { %v469_v50 = vpack.c.bf16 %v455_v42, %v454_v41  ;;  %v463_v55 = vmax.f32 %v433_v48, 0.0 }
  0xef   : > { %v468_v53 = vpack.c.bf16 %v453_v46, %v452_v45  ;;  %v945_v54 = vpop.f32.mrb[4].mxu0  ;;  %v461_v58 = vmax.f32 %v425_v52, 0.0 }
  0xf0   : > { %v414_v56 = vadd.f32 %v945_v54, %v870_v29  ;;  %v405_v57 = vpop.f32.mrb[5].mxu0  ;;  %v473_v61 = vpack.c.bf16 %v463_v55, %v462_v47 }
  0xf1   : > { %v406_v59 = vadd.f32 %v870_v29, %v405_v57  ;;  %v946_v60 = vpop.f32.mrb[6].mxu0  ;;  %959 = vmatprep.mubr.msk.bf16.mxu1 %vm330_vm0, %v468_v53  ;;  %v472_v0 = vpack.c.bf16 %v461_v58, %v460_v51  ;;  %v953_v1 = vpop.f32.mrb[4].mxu1 }
  0xf2   : > { %v417_v62 = vadd.f32 %v946_v60, %v870_v29  ;;  %v408_v63 = vpop.f32.mrb[7].mxu0  ;;  %960 = vmatmul.mubr.msk.bf16.vlgmr.msra.gmra.mrb[8].mxu1 %vm330_vm0, %v469_v50  ;;  %v446_v3 = vadd.f32 %v953_v1, %v870_v29  ;;  %v437_v4 = vpop.f32.mrb[5].mxu1  ;;  %v458_v5 = vmax.f32 %v414_v56, 0.0 }
  0xf3   : > { %v409_v2 = vadd.f32 %v870_v29, %v408_v63  ;;  %v438_v7 = vadd.f32 %v870_v29, %v437_v4  ;;  %v954_v8 = vpop.f32.mrb[6].mxu1  ;;  %v456_v9 = vmax.f32 %v406_v59, 0.0 }
  0xf4   : > { %v459_v6 = vmax.f32 %v417_v62, 0.0  ;;  %v466_v11 = vmax.f32 %v446_v3, 0.0  ;;  %v449_v12 = vadd.f32 %v954_v8, %v870_v29  ;;  %v440_v13 = vpop.f32.mrb[7].mxu1 }
  0xf5   : > { %v457_v10 = vmax.f32 %v409_v2, 0.0  ;;  %v464_v15 = vmax.f32 %v438_v7, 0.0  ;;  %v441_v16 = vadd.f32 %v870_v29, %v440_v13 }
  0xf6   : > { %v471_v14 = vpack.c.bf16 %v459_v6, %v458_v5  ;;  %v467_v18 = vmax.f32 %v449_v12, 0.0 }
  0xf7   : > { %v470_v17 = vpack.c.bf16 %v457_v10, %v456_v9  ;;  %v465_v19 = vmax.f32 %v441_v16, 0.0  ;;  %v892_v16 = vld [vmem:[%s1194_s6] ss:$0 sm:$0xff] }
  0xf8   : > { %v475_v20 = vpack.c.bf16 %v467_v18, %v466_v11 }
  0xf9   : > { %963 = vmatprep.mubr.msk.bf16.mxu1 %vm330_vm0, %v470_v17  ;;  %v474_v21 = vpack.c.bf16 %v465_v19, %v464_v15 }
  0xfa   : > { %964 = vmatmul.mubr.msk.bf16.gmra.mrb[12].mxu1 %vm330_vm0, %v471_v14 }
  0xfb   : > { %967 = vmatprep.mubr.msk.bf16.mxu1 %vm330_vm0, %v472_v0 }
 0x102   : > { %968 = vmatmul.mubr.msk.bf16.gmra.mrb[16].mxu1 %vm330_vm0, %v473_v61 }
 0x103   : > { %971 = vmatprep.mubr.msk.bf16.mxu1 %vm330_vm0, %v474_v21 }
 0x10a   : > { %972 = vmatmul.mubr.msk.bf16.gmra.mrb[20].mxu1 %vm330_vm0, %v475_v20 }
 0x1c5   : > { %v961_v24 = vpop.f32.mrb[8].mxu1 }
 0x1c6   : > { %v566_v25 = vadd.f32 %v961_v24, %v881_v23  ;;  %v557_v26 = vpop.f32.mrb[9].mxu1 }
 0x1c7   : > { %v558_v27 = vadd.f32 %v881_v23, %v557_v26  ;;  %v962_v28 = vpop.f32.mrb[10].mxu1 }
 0x1c8   : > { %v569_v29 = vadd.f32 %v962_v28, %v881_v23  ;;  %v560_v30 = vpop.f32.mrb[11].mxu1  ;;  %v622_v32 = vmax.f32 %v566_v25, 0.0 }
 0x1c9   : > { %v561_v31 = vadd.f32 %v881_v23, %v560_v30  ;;  %v620_v34 = vmax.f32 %v558_v27, 0.0 }
 0x1ca   : > { %v623_v33 = vmax.f32 %v569_v29, 0.0 }
 0x1cb   : > { %v621_v35 = vmax.f32 %v561_v31, 0.0 }
 0x1cc   : > { %v637_v36 = vpack.c.bf16 %v623_v33, %v622_v32 }
 0x1cd   : > { %v636_v37 = vpack.c.bf16 %v621_v35, %v620_v34  ;;  %v965_v38 = vpop.f32.mrb[12].mxu1 }
 0x1ce   : > { %v582_v39 = vadd.f32 %v965_v38, %v881_v23  ;;  %v573_v40 = vpop.f32.mrb[13].mxu1 }
 0x1cf   : > { %v574_v41 = vadd.f32 %v881_v23, %v573_v40  ;;  %v966_v42 = vpop.f32.mrb[14].mxu1  ;;  %979 = vmatprep.mubr.msk.bf16.mxu0 %vm330_vm0, %v636_v37 }
 0x1d0   : > { %v585_v43 = vadd.f32 %v966_v42, %v881_v23  ;;  %v576_v44 = vpop.f32.mrb[15].mxu1  ;;  %980 = vmatmul.mubr.msk.bf16.vlgmr.msra.gmra.mrb[8].mxu0 %vm330_vm0, %v637_v36  ;;  %v626_v46 = vmax.f32 %v582_v39, 0.0 }
 0x1d1   : > { %v577_v45 = vadd.f32 %v881_v23, %v576_v44  ;;  %v624_v48 = vmax.f32 %v574_v41, 0.0 }
 0x1d2   : > { %v627_v47 = vmax.f32 %v585_v43, 0.0 }
 0x1d3   : > { %v625_v49 = vmax.f32 %v577_v45, 0.0 }
 0x1d4   : > { %v639_v50 = vpack.c.bf16 %v627_v47, %v626_v46 }
 0x1d5   : > { %v638_v51 = vpack.c.bf16 %v625_v49, %v624_v48  ;;  %v969_v52 = vpop.f32.mrb[16].mxu1 }
 0x1d6   : > { %v598_v53 = vadd.f32 %v969_v52, %v881_v23  ;;  %v589_v54 = vpop.f32.mrb[17].mxu1 }
 0x1d7   : > { %v590_v55 = vadd.f32 %v881_v23, %v589_v54  ;;  %v970_v56 = vpop.f32.mrb[18].mxu1  ;;  %983 = vmatprep.mubr.msk.bf16.mxu0 %vm330_vm0, %v638_v51 }
 0x1d8   : > { %v601_v57 = vadd.f32 %v970_v56, %v881_v23  ;;  %v592_v58 = vpop.f32.mrb[19].mxu1  ;;  %984 = vmatmul.mubr.msk.bf16.gmra.mrb[12].mxu0 %vm330_vm0, %v639_v50  ;;  %v630_v60 = vmax.f32 %v598_v53, 0.0 }
 0x1d9   : > { %v593_v59 = vadd.f32 %v881_v23, %v592_v58  ;;  %v628_v62 = vmax.f32 %v590_v55, 0.0 }
 0x1da   : > { %v631_v61 = vmax.f32 %v601_v57, 0.0 }
 0x1db   : > { %v629_v63 = vmax.f32 %v593_v59, 0.0 }
 0x1dc   : > { %v641_v0 = vpack.c.bf16 %v631_v61, %v630_v60 }
 0x1dd   : > { %v640_v1 = vpack.c.bf16 %v629_v63, %v628_v62  ;;  %v973_v2 = vpop.f32.mrb[20].mxu1 }
 0x1de   : > { %v614_v3 = vadd.f32 %v973_v2, %v881_v23  ;;  %v605_v4 = vpop.f32.mrb[21].mxu1 }
 0x1df   : > { %v606_v5 = vadd.f32 %v881_v23, %v605_v4  ;;  %v974_v6 = vpop.f32.mrb[22].mxu1  ;;  %987 = vmatprep.mubr.msk.bf16.mxu0 %vm330_vm0, %v640_v1 }
 0x1e0   : > { %v617_v7 = vadd.f32 %v974_v6, %v881_v23  ;;  %v608_v8 = vpop.f32.mrb[23].mxu1  ;;  %988 = vmatmul.mubr.msk.bf16.gmra.mrb[16].mxu0 %vm330_vm0, %v641_v0  ;;  %v634_v10 = vmax.f32 %v614_v3, 0.0 }
 0x1e1   : > { %v609_v9 = vadd.f32 %v881_v23, %v608_v8  ;;  %v632_v12 = vmax.f32 %v606_v5, 0.0 }
 0x1e2   : > { %v635_v11 = vmax.f32 %v617_v7, 0.0 }
 0x1e3   : > { %v633_v13 = vmax.f32 %v609_v9, 0.0 }
 0x1e4   : > { %v643_v14 = vpack.c.bf16 %v635_v11, %v634_v10 }
 0x1e5   : > { %v642_v15 = vpack.c.bf16 %v633_v13, %v632_v12 }
 0x1e7   : > { %991 = vmatprep.mubr.msk.bf16.mxu0 %vm330_vm0, %v642_v15 }
 0x1e8   : > { %992 = vmatmul.mubr.msk.bf16.gmra.mrb[20].mxu0 %vm330_vm0, %v643_v14 }
 0x2a3   : > { %v981_v17 = vpop.f32.mrb[8].mxu0 }
 0x2a4   : > { %v734_v18 = vadd.f32 %v981_v17, %v892_v16  ;;  %v725_v19 = vpop.f32.mrb[9].mxu0 }
 0x2a5   : > { %v726_v20 = vadd.f32 %v892_v16, %v725_v19  ;;  %v982_v21 = vpop.f32.mrb[10].mxu0 }
 0x2a6   : > { %791 = vst.msk [vmem:[%s1151_s30 + $0x10] sm:$0xff] %vm788_vm1, %v734_v18  ;;  %v737_v22 = vadd.f32 %v982_v21, %v892_v16  ;;  %v728_v23 = vpop.f32.mrb[11].mxu0 }
 0x2a7   : > { %789 = vst.msk [vmem:[%s1151_s30] sm:$0xff] %vm788_vm1, %v726_v20  ;;  %v729_v24 = vadd.f32 %v892_v16, %v728_v23 }
 0x2a8   : > { %792 = vst.msk [vmem:[%s1151_s30 + $0x18] sm:$0xff] %vm788_vm1, %v737_v22 }
 0x2a9   : > { %790 = vst.msk [vmem:[%s1151_s30 + $0x8] sm:$0xff] %vm788_vm1, %v729_v24 }
 0x2ab   : > { %v985_v25 = vpop.f32.mrb[12].mxu0 }
 0x2ac   : > { %v750_v26 = vadd.f32 %v985_v25, %v892_v16  ;;  %v741_v27 = vpop.f32.mrb[13].mxu0 }
 0x2ad   : > { %v742_v28 = vadd.f32 %v892_v16, %v741_v27  ;;  %v986_v29 = vpop.f32.mrb[14].mxu0 }
 0x2ae   : > { %795 = vst.msk [vmem:[%s1151_s30 + $0x30] sm:$0xff] %vm788_vm1, %v750_v26  ;;  %v753_v30 = vadd.f32 %v986_v29, %v892_v16  ;;  %v744_v31 = vpop.f32.mrb[15].mxu0 }
 0x2af   : > { %793 = vst.msk [vmem:[%s1151_s30 + $0x20] sm:$0xff] %vm788_vm1, %v742_v28  ;;  %v745_v32 = vadd.f32 %v892_v16, %v744_v31 }
 0x2b0   : > { %796 = vst.msk [vmem:[%s1151_s30 + $0x38] sm:$0xff] %vm788_vm1, %v753_v30 }
 0x2b1   : > { %794 = vst.msk [vmem:[%s1151_s30 + $0x28] sm:$0xff] %vm788_vm1, %v745_v32 }
 0x2b3   : > { %v989_v33 = vpop.f32.mrb[16].mxu0 }
 0x2b4   : > { %v766_v34 = vadd.f32 %v989_v33, %v892_v16  ;;  %v757_v35 = vpop.f32.mrb[17].mxu0 }
 0x2b5   : > { %v758_v36 = vadd.f32 %v892_v16, %v757_v35  ;;  %v990_v37 = vpop.f32.mrb[18].mxu0 }
 0x2b6   : > { %799 = vst.msk [vmem:[%s1151_s30 + $0x50] sm:$0xff] %vm788_vm1, %v766_v34  ;;  %v769_v38 = vadd.f32 %v990_v37, %v892_v16  ;;  %v760_v39 = vpop.f32.mrb[19].mxu0 }
 0x2b7   : > { %797 = vst.msk [vmem:[%s1151_s30 + $0x40] sm:$0xff] %vm788_vm1, %v758_v36  ;;  %v761_v40 = vadd.f32 %v892_v16, %v760_v39 }
 0x2b8   : > { %800 = vst.msk [vmem:[%s1151_s30 + $0x58] sm:$0xff] %vm788_vm1, %v769_v38 }
 0x2b9   : > { %798 = vst.msk [vmem:[%s1151_s30 + $0x48] sm:$0xff] %vm788_vm1, %v761_v40 }
 0x2bb   : > { %v993_v41 = vpop.f32.mrb[20].mxu0 }
 0x2bc   : > { %v782_v42 = vadd.f32 %v993_v41, %v892_v16  ;;  %v773_v43 = vpop.f32.mrb[21].mxu0 }
 0x2bd   : > { %v774_v44 = vadd.f32 %v892_v16, %v773_v43  ;;  %v994_v45 = vpop.f32.mrb[22].mxu0 }
 0x2be   : > { %803 = vst.msk [vmem:[%s1151_s30 + $0x70] sm:$0xff] %vm788_vm1, %v782_v42  ;;  %v785_v46 = vadd.f32 %v994_v45, %v892_v16  ;;  %v776_v47 = vpop.f32.mrb[23].mxu0 }
 0x2bf   : > { %801 = vst.msk [vmem:[%s1151_s30 + $0x60] sm:$0xff] %vm788_vm1, %v774_v44  ;;  %v777_v48 = vadd.f32 %v892_v16, %v776_v47 }
 0x2c0   : > { %804 = vst.msk [vmem:[%s1151_s30 + $0x78] sm:$0xff] %vm788_vm1, %v785_v46 }
 0x2c1   : > { %802 = vst.msk [vmem:[%s1151_s30 + $0x68] sm:$0xff] %vm788_vm1, %v777_v48 }
 0x2c2 PF: > { %s17_s24 = sadd.s32 1, %s1019_s24  }
 0x2c3   : > { %p14_p4 = scmp.ge.s32.totalorder %s17_s24, 4  }
 0x2c5   :  { %16 = sbr.rel (!%p14_p4) target bundleno = 1 (0x1), region = 78 }

</bundles_post_ra>
